<compile_context>
chip_gen: v7x
topology: tpu7x:2x2x1
jax: 0.10.0
libtpu: 0.0.40
codegen_flags: <defaults>
</compile_context>

<pallas_src>
import jax
import jax.numpy as jnp
from jax.experimental import pallas as pl
from jax.experimental.pallas import tpu as pltpu


_TM = 512    # sublane tile (PyTorch index2 == i)
_TN = 2048   # lane tile    (PyTorch index1 == j)


def _round_up(x, m):
    return ((x + m - 1) // m) * m


def _svm_rank_tile_kernel(pred_j_ref, time_j_ref,   # (1, TN)  row operands (index1 == j)
                          pred_i_ref, time_i_ref,   # (TM, 1)  col operands (index2 == i)
                          out_ref):                 # (1, 1, TN) per-(row-tile, column) partials
    pred_j = pred_j_ref[...]     # pred[index1]
    time_j = time_j_ref[...]     # time[index1]  (-inf on j padding)
    pred_i = pred_i_ref[...]     # pred[index2]
    time_i = time_i_ref[...]     # time_eff[index2]: +inf where event != 1 or i padding

    # hinge(i, j) = clamp(1 - pred[j] + pred[i], 0), counted only where
    # time[j] > time_eff[i]  (the event mask is already folded into time_eff).
    rank = (1.0 - pred_j) + pred_i                 # (TM, TN) via broadcast
    clamped = jnp.maximum(rank, 0.0)
    sq = clamped * clamped
    contrib = jnp.where(time_j > time_i, sq, 0.0)  # single select, no 0/1 mask multiply

    # Reduce only over the sublane (i) axis; the cross-lane reduction is
    # deferred to the wrapper so the kernel never does a full scalar reduce
    # plus scalar-to-vreg broadcast per grid step.
    out_ref[...] = jnp.sum(contrib, axis=0)[None, None, :]


def svm_loss(pred, target, r=1.0, reduction="mean"):
    """Pallas TPU implementation of SVMLoss.forward."""
    if reduction not in ("mean", "sum"):
        raise NotImplementedError("%s is not implemented." % reduction)

    pred_v = jnp.squeeze(pred, axis=-1).astype(jnp.float32)   # (N,)
    time_v = target[:, 0].astype(jnp.float32)
    event_v = target[:, 1].astype(jnp.float32)
    n = pred_v.shape[0]

    # ---- O(N) regression term: plain JAX (memory-trivial, kept out of the
    #      O(N^2) kernel so it is not recomputed per pair tile).
    diff = pred_v - time_v
    reg = jnp.where(event_v == 0.0, jnp.maximum(diff, 0.0), diff)
    reg_sq = reg * reg
    regression_loss = jnp.mean(reg_sq) if reduction == "mean" else jnp.sum(reg_sq)

    # ---- O(N^2) ranking numerator: tiled Pallas kernel.
    tn = min(_TN, _round_up(n, 128))   # lane tile    (index1 == j)
    tm = min(_TM, _round_up(n, 8))     # sublane tile (index2 == i)
    n_j = _round_up(n, tn)
    n_i = _round_up(n, tm)
    n_row_tiles = n_i // tm
    n_col_tiles = n_j // tn
    pad_j = n_j - n
    pad_i = n_i - n

    # event folded into the i-axis time operand: invalid / padded index2 rows
    # get +inf so 'time[j] > time_eff[i]' is never true.  Padded index1
    # columns get -inf so they are never counted either.
    time_i_eff = jnp.where(event_v == 1.0, time_v, jnp.inf)
    pred_j = jnp.pad(pred_v, (0, pad_j)).reshape(1, n_j)
    time_j = jnp.pad(time_v, (0, pad_j), constant_values=-jnp.inf).reshape(1, n_j)
    pred_i = jnp.pad(pred_v, (0, pad_i)).reshape(n_i, 1)
    time_i = jnp.pad(time_i_eff, (0, pad_i), constant_values=jnp.inf).reshape(n_i, 1)

    part_sum = pl.pallas_call(
        _svm_rank_tile_kernel,
        grid=(n_row_tiles, n_col_tiles),
        in_specs=[
            pl.BlockSpec((1, tn), lambda i, j: (0, j)),   # pred[index1]
            pl.BlockSpec((1, tn), lambda i, j: (0, j)),   # time[index1]
            pl.BlockSpec((tm, 1), lambda i, j: (i, 0)),   # pred[index2]
            pl.BlockSpec((tm, 1), lambda i, j: (i, 0)),   # time_eff[index2]
        ],
        # Each (i, j) grid step writes its own lane-dense block exactly once,
        # so there is no accumulation state and both axes can be parallel.
        out_specs=pl.BlockSpec((1, 1, tn), lambda i, j: (i, 0, j)),
        out_shape=jax.ShapeDtypeStruct((n_row_tiles, 1, n_j), jnp.float32),
        compiler_params=pltpu.CompilerParams(
            dimension_semantics=("parallel", "parallel"),
            vmem_limit_bytes=48 * 1024 * 1024,
        ),
    )(pred_j, time_j, pred_i, time_i)

    total = jnp.sum(part_sum)

    if reduction == "mean":
        # Pair count depends only on (time, event): O(N log N) in the wrapper.
        # #{j : time[j] > t} == N - searchsorted(sorted_time, t, side='right')
        # (strict '>', ties excluded, matching the PyTorch mask).
        sorted_time = jnp.sort(time_v)
        greater = n - jnp.searchsorted(sorted_time, time_v, side="right")
        # Sum in f32: exact for counts < 2^24; only ulp-level error beyond
        # that, negligible as a mean denominator.
        count = jnp.sum(jnp.where(event_v == 1.0, greater.astype(jnp.float32), 0.0))
        # 0/0 -> NaN on purpose: matches torch.mean over an empty selection.
        ranking_loss = total / count
    else:
        ranking_loss = total

    return r * ranking_loss + (1.0 - r) * regression_loss


def _svm_loss_ref(pred, target, r=1.0, reduction="mean"):
    """Dense pure-JAX reference (small N only), mirrors the PyTorch module."""
    p = jnp.squeeze(pred, axis=-1).astype(jnp.float32)
    t = target[:, 0].astype(jnp.float32)
    e = target[:, 1].astype(jnp.float32)
    diff = p - t
    reg = jnp.where(e == 0.0, jnp.maximum(diff, 0.0), diff)
    regression = jnp.mean(reg * reg) if reduction == "mean" else jnp.sum(reg * reg)
    rank = 1.0 - p[None, :] + p[:, None]                     # [i, j] = 1 - p[j] + p[i]
    mask = (t[None, :] > t[:, None]) & (e[:, None] == 1.0)
    sq = jnp.maximum(rank, 0.0) ** 2
    masked = jnp.where(mask, sq, 0.0)
    if reduction == "mean":
        ranking = jnp.sum(masked) / jnp.sum(mask)
    else:
        ranking = jnp.sum(masked)
    return r * ranking + (1.0 - r) * regression


if __name__ == "__main__":
    key = jax.random.PRNGKey(0)
    k_pred, k_time, k_pred2, k_time2, k_event2 = jax.random.split(key, 5)

    # ---- Small deterministic case (N = 8), matching the module's expected shapes.
    n = 8
    pred = jax.random.normal(k_pred, (n, 1), dtype=jnp.float32)          # (N, 1)
    time = jax.random.uniform(k_time, (n,), minval=0.5, maxval=5.0)      # survival times
    event = jnp.array([1, 0, 1, 1, 0, 1, 0, 1], dtype=jnp.float32)       # censoring indicator
    target = jnp.stack([time, event], axis=1)                            # (N, 2)

    for red in ("mean", "sum"):
        out = svm_loss(pred, target, r=0.5, reduction=red)
        jax.block_until_ready(out)
        ref = _svm_loss_ref(pred, target, r=0.5, reduction=red)
        assert jnp.allclose(out, ref, rtol=1e-4, atol=1e-5), (red, out, ref)

    # ---- Larger case exercising multiple tiles plus padding on both axes.
    n2 = 2500
    pred2 = jax.random.normal(k_pred2, (n2, 1), dtype=jnp.float32)
    time2 = jax.random.uniform(k_time2, (n2,), minval=0.5, maxval=5.0)
    event2 = (jax.random.uniform(k_event2, (n2,)) < 0.7).astype(jnp.float32)
    target2 = jnp.stack([time2, event2], axis=1)

    for red in ("mean", "sum"):
        out = svm_loss(pred2, target2, r=0.5, reduction=red)
        jax.block_until_ready(out)
        ref = _svm_loss_ref(pred2, target2, r=0.5, reduction=red)
        assert jnp.allclose(out, ref, rtol=1e-3), (red, out, ref)

    print("KERNEL_OK")
</pallas_src>

<mosaic_0001>
module attributes {stable_mosaic.version = 11 : i64} {
  func.func @_svm_rank_tile_kernel(%arg0: i32, %arg1: i32, %arg2: memref<1x128xf32, #tpu.memory_space<vmem>>, %arg3: memref<1x128xf32, #tpu.memory_space<vmem>>, %arg4: memref<8x1xf32, #tpu.memory_space<vmem>>, %arg5: memref<8x1xf32, #tpu.memory_space<vmem>>, %arg6: memref<1x1x128xf32, #tpu.memory_space<vmem>>) attributes {dimension_semantics = [#tpu.dimension_semantics<parallel>, #tpu.dimension_semantics<parallel>], iteration_bounds = array<i64: 1, 1>, scalar_prefetch = 0 : i64, scratch_operands = 0 : i64, tpu.core_type = #tpu.core_type<tc>, window_params = [{transform_indices = @transform_0, window_bounds = array<i64: 1, 128>}, {transform_indices = @transform_1, window_bounds = array<i64: 1, 128>}, {transform_indices = @transform_2, window_bounds = array<i64: 8, 1>}, {transform_indices = @transform_3, window_bounds = array<i64: 8, 1>}, {transform_indices = @transform_4, window_bounds = array<i64: 1, 1, 128>}]} {
    %c0 = arith.constant 0 : index
    %c0_0 = arith.constant 0 : index
    %0 = vector.load %arg2[%c0, %c0_0] : memref<1x128xf32, #tpu.memory_space<vmem>>, vector<1x128xf32>
    %c0_1 = arith.constant 0 : index
    %c0_2 = arith.constant 0 : index
    %1 = vector.load %arg3[%c0_1, %c0_2] : memref<1x128xf32, #tpu.memory_space<vmem>>, vector<1x128xf32>
    %c0_3 = arith.constant 0 : index
    %c0_4 = arith.constant 0 : index
    %2 = vector.load %arg4[%c0_3, %c0_4] : memref<8x1xf32, #tpu.memory_space<vmem>>, vector<8x1xf32>
    %c0_5 = arith.constant 0 : index
    %c0_6 = arith.constant 0 : index
    %3 = vector.load %arg5[%c0_5, %c0_6] : memref<8x1xf32, #tpu.memory_space<vmem>>, vector<8x1xf32>
    %cst = arith.constant 1.000000e+00 : f32
    %4 = vector.broadcast %cst : f32 to vector<1x128xf32>
    %5 = arith.subf %4, %0 : vector<1x128xf32>
    %6 = vector.broadcast %5 : vector<1x128xf32> to vector<8x128xf32>
    %7 = vector.broadcast %2 : vector<8x1xf32> to vector<8x128xf32>
    %8 = arith.addf %6, %7 : vector<8x128xf32>
    %cst_7 = arith.constant 0.000000e+00 : f32
    %9 = vector.broadcast %cst_7 : f32 to vector<8x128xf32>
    %10 = arith.maximumf %8, %9 : vector<8x128xf32>
    %11 = arith.mulf %10, %10 : vector<8x128xf32>
    %12 = vector.broadcast %1 : vector<1x128xf32> to vector<8x128xf32>
    %13 = vector.broadcast %3 : vector<8x1xf32> to vector<8x128xf32>
    %14 = arith.cmpf ogt, %12, %13 : vector<8x128xf32>
    %cst_8 = arith.constant 0.000000e+00 : f32
    %15 = vector.broadcast %cst_8 : f32 to vector<8x128xf32>
    %16 = arith.select %14, %11, %15 : vector<8x128xi1>, vector<8x128xf32>
    %cst_9 = arith.constant dense<0.000000e+00> : vector<128xf32>
    %17 = vector.multi_reduction <add>, %16, %cst_9 [0] : vector<8x128xf32> to vector<128xf32>
    %18 = vector.shape_cast %17 : vector<128xf32> to vector<1x1x128xf32>
    %c0_10 = arith.constant 0 : index
    %c0_11 = arith.constant 0 : index
    %c0_12 = arith.constant 0 : index
    %19 = vector.load %arg6[%c0_10, %c0_11, %c0_12] : memref<1x1x128xf32, #tpu.memory_space<vmem>>, vector<1x1x128xf32>
    tpu.vector_store %arg6[%c0_10, %c0_11, %c0_12], %18 {strides = array<i32>} : memref<1x1x128xf32, #tpu.memory_space<vmem>>, vector<1x1x128xf32>,
    return
  }
  func.func @transform_0(%arg0: i32, %arg1: i32) -> (i32, i32) {
    %c0_i32 = arith.constant 0 : i32
    %c0_i32_0 = arith.constant 0 : i32
    return %c0_i32, %arg1 : i32, i32
  }
  func.func @transform_1(%arg0: i32, %arg1: i32) -> (i32, i32) {
    %c0_i32 = arith.constant 0 : i32
    %c0_i32_0 = arith.constant 0 : i32
    return %c0_i32, %arg1 : i32, i32
  }
  func.func @transform_2(%arg0: i32, %arg1: i32) -> (i32, i32) {
    %c0_i32 = arith.constant 0 : i32
    %c0_i32_0 = arith.constant 0 : i32
    return %arg0, %c0_i32 : i32, i32
  }
  func.func @transform_3(%arg0: i32, %arg1: i32) -> (i32, i32) {
    %c0_i32 = arith.constant 0 : i32
    %c0_i32_0 = arith.constant 0 : i32
    return %arg0, %c0_i32 : i32, i32
  }
  func.func @transform_4(%arg0: i32, %arg1: i32) -> (i32, i32, i32) {
    %c0_i32 = arith.constant 0 : i32
    %c0_i32_0 = arith.constant 0 : i32
    return %arg0, %c0_i32, %arg1 : i32, i32, i32
  }
}

</mosaic_0001>

<bundles_post_ra>
// kernel: tpu_custom_call.1
= control target key start
LH: loop header
LB: loop body
LE: loop exit
PB: predicated region body
PF: predicated region fallthrough
CT: control target
= control target key end

     0   :  { %v99_v1 = vmov 0   ;;  %s150_s0 = inlined_call_operand.vmem [shape: f32[1,128], index: 0, kind: input, shape index: {}]   ;;  %s151_s1 = inlined_call_operand.vmem [shape: f32[1,128], index: 1, kind: input, shape index: {}]   ;;  %s152_s2 = inlined_call_operand.vmem [shape: f32[8,1], index: 2, kind: input, shape index: {}]   ;;  %s153_s3 = inlined_call_operand.vmem [shape: f32[8,1], index: 3, kind: input, shape index: {}]   ;;  %s154_s4 = inlined_call_operand.hbm [shape: f32[1,1,128], index: 4, kind: output, shape index: {}]  }
   0x1   :  { %v20_v0 = vld [vmem:[%s152_s2] sm:$0xff]  ;;  %74 = vset.pattern.permute.xlu0 %v99_v1 }
   0x2   :  { %9 = vsyncpa [#allocation3], 0  ;;  %31 = vperm.xlu0 %74, %v20_v0   ;;  %v21_v2 = vld [vmem:[%s153_s3] sm:$0xff]  ;;  %v24_v3 = vlaneseq  ;;  %s100_s3 = smov [#allocation2]  }
   0x3   :  { %v18_v5 = vld [vmem:[%s150_s0] sm:$0x1]  ;;  %s63_s0 = sshll.u32 %s100_s3, 4  ;;  %s64_s0 = int_to_ptr.vmem [resolvable:$true] %s63_s0 }
   0x4   :  { %v25_v4 = vshrl.u32 %v24_v3, 7  ;;  %v22_v7 = vsub.f32 1.0, %v18_v5  ;;  %v71_v11 = vld [vmem:[%s151_s1] ss:$0 sm:$0xff]  ;;  %s75_s22 = scalar_lea.vmem %s64_s0, 16  ;;  %s79_s23 = scalar_lea.vmem %s64_s0, 32 }
   0x5   :  { %p76_p0 = scmp.ne.s32.totalorder %s64_s0, %s75_s22  ;;  %p80_p1 = scmp.lt.s32.totalorder %s64_s0, %s64_s0 }
   0x6   :  { %45 = vperm.xlu0 %74, %v21_v2   ;;  %v26_v6 = vsub.s32 0, %v25_v4  ;;  %p81_p2 = scmp.lt.s32.totalorder %s79_s23, %s75_s22 }
   0x8   :  { %v27_v8 = vrot.slane %v22_v7, %v26_v6  ;;  %p82_p3 = por %p81_p2, %p80_p1 }
   0xa   :  { %p83_p4 = pnand %p82_p3, %p76_p0 }
  0x81   :  { %v32_v9 = vpop.permute.xlu0 %31 }
  0x82   :  { %v34_v10 = vadd.f32 %v32_v9, %v27_v8 }
  0x84   :  { %v35_v12 = vmax.f32 %v34_v10, 0.0 }
  0x85   :  { %v46_v13 = vpop.permute.xlu0 %45 }
  0x86   :  { %v36_v14 = vmul.f32 %v35_v12, %v35_v12  ;;  %vm48_vm0 = vcmp.gt.f32.partialorder %v71_v11, %v46_v13 }
  0x88   :  { %v49_v15 = vsel %vm48_vm0, %v36_v14, 0.0 }
  0x89   :  { %v50_v16 = vrot.slane %v49_v15, 4 }
  0x8b   :  { %v51_v17 = vadd.f32 %v50_v16, %v49_v15 }
  0x8d   :  { %v52_v18 = vrot.slane %v51_v17, 2 }
  0x8f   :  { %v53_v19 = vadd.f32 %v52_v18, %v51_v17 }
  0x91   :  { %v54_v20 = vrot.slane %v53_v19, 1 }
  0x93   :  { %v55_v21 = vadd.f32 %v54_v20, %v53_v19 }
  0x95   :  { %56 = vst [vmem:[#allocation2] sm:$0x1] %v55_v21 }
  0x96   :  { %86 = shalt.err (!%p83_p4)
}
  0x97   :  { %s87_s25 = scalar_lea.hbm %s154_s4, 16 }
  0x98   :  { %p88_p5 = scmp.ne.s32.totalorder %s154_s4, %s87_s25  ;;  %p91_p6 = scmp.lt.u32.totalorder %s87_s25, %s154_s4 }
  0x9a   :  { %p93_p7 = pnand %p91_p6, %p88_p5 }
  0x9c   :  { %96 = shalt.err (!%p93_p7)
}
  0x9d   :  { %66 = dma.vmem_to_hbm [thread:$0]  %s64_s0, 16, %s154_s4, [#allocation3]  }
  0x9e   :  { %97 = dma.done.wait [#allocation3], 16  }
  0x9f   :  { %98 = vsyncadd [#allocation3], 4294967280 }
  0xa0   :  { %70 = vsyncpa [#allocation3], 1 }

</bundles_post_ra>
